<compile_context>
chip_gen: v7x
topology: tpu7x:2x2x1
jax: 0.10.0
libtpu: 0.0.40
codegen_flags: <defaults>
</compile_context>

<pallas_src>
import jax
import jax.numpy as jnp
from jax.experimental import pallas as pl
from jax.experimental.pallas import tpu as pltpu

_FALLBACK_VMEM_CAP = 64 * 1024 * 1024   # v7x per-TC physical (most restrictive gen)


def _vmem_caps():
    """Return (tile_budget_bytes, vmem_limit_bytes) for the current chip generation."""
    cap = None
    try:
        info = pltpu.get_tpu_info()
        cap = getattr(info, "vmem_capacity_bytes", None)
    except Exception:
        cap = None
    if not cap or cap < 16 * 1024 * 1024:
        cap = _FALLBACK_VMEM_CAP
    limit = min(int(cap * 0.70), 96 * 1024 * 1024)   # headroom for Mosaic internals
    budget = int(limit * 0.75)                       # what the tile chooser may spend
    return budget, limit


# --------------------------------------------------------------------------- kernels
def _pw_kernel(x_ref, bias_ref, w_ref, o_ref):
    # x_ref: (tm, K)  bias_ref: (1, K)  w_ref: (K, tn)  o_ref: (tm, tn)
    xc = x_ref[...] - bias_ref[...]                      # VPU, hidden under tile DMA
    o_ref[...] = jnp.dot(
        xc, w_ref[...], preferred_element_type=jnp.float32
    ).astype(o_ref.dtype)                                # MXU, f32 accumulation


def _pw_kernel_acc(x_ref, bias_ref, w_ref, o_ref, acc_ref):
    # K-tiled variant: x_ref (tm, tk), bias_ref (1, tk), w_ref (tk, tn),
    # o_ref (tm, tn), acc_ref (tm, tn) f32 scratch.  K axis is grid axis 2 (innermost).
    k = pl.program_id(2)

    @pl.when(k == 0)
    def _():
        acc_ref[...] = jnp.zeros_like(acc_ref)

    xc = x_ref[...] - bias_ref[...]
    acc_ref[...] += jnp.dot(xc, w_ref[...], preferred_element_type=jnp.float32)

    @pl.when(k == pl.num_programs(2) - 1)
    def _():
        o_ref[...] = acc_ref[...].astype(o_ref.dtype)


# ------------------------------------------------------------------------ tile chooser
def _choose_tiles(M, K, N, x_is, w_is, budget):
    """Pick (tm, tn, tk) that pipeline well and stay inside the VMEM budget."""
    sub = {4: 8, 2: 16, 1: 32}.get(x_is, 8)              # sublane packing of x dtype

    tn = 512 if (N > 512 and N % 128 == 0) else N        # lane-dense N tile
    tm = M if M <= 512 else 512                          # capped row tile
    tk = K                                               # start un-tiled in K

    def fits(tm_, tn_, tk_):
        k_tiled = tk_ < K
        b = (2 * tm_ * tk_ * x_is          # x tile, double-buffered
             + 2 * tk_ * tn_ * w_is        # weight tile, double-buffered
             + 2 * tk_ * w_is              # bias row, double-buffered
             + 2 * tm_ * tn_ * x_is        # output tile, double-buffered
             + tm_ * tk_ * 4               # (x - bias) temporary (conservative f32)
             + (tm_ * tn_ * 4 if k_tiled else 0))   # accumulator scratch
        return b <= budget

    # 1) K tiling first (keeps tm/tn large).  Only exact divisors that are
    #    128-multiples, so the reduction never sees a ragged/padded K block.
    if not fits(tm, tn, tk) and K > 128:
        for cand in (2048, 1024, 512, 256, 128):
            if cand < K and K % cand == 0:
                tk = cand
                if fits(tm, tn, tk):
                    break
    # 2) shrink tm, but not below 256 yet (MXU fill on v6e/v7x)
    while not fits(tm, tn, tk) and tm > 256:
        tm = max(256, ((tm // 2) + sub - 1) // sub * sub)
    # 3) shrink tn in 128-steps (only when N is 128-tileable)
    while not fits(tm, tn, tk) and tn > 128 and tn % 128 == 0:
        tn = max(128, ((tn // 2) + 127) // 128 * 128)
    # 4) last resort: shrink tm down to the sublane minimum
    while not fits(tm, tn, tk) and tm > sub:
        tm = max(sub, (tm // 2) // sub * sub)
    return tm, tn, tk, sub


# ------------------------------------------------------------------------ param prep
def prepare_pw_params(bias, weight):
    """One-time parameter preparation (do at load time, NOT per forward call).

    bias:   (input_size,)
    weight: (output_size, input_size)   -- PyTorch nn.Linear layout

    Returns (bias2, w_t): bias reshaped to (1, K), weight pre-transposed to (K, N).
    """
    w_t = jnp.asarray(weight).T                 # (K, N)
    bias2 = jnp.asarray(bias).reshape(1, -1)    # (1, K)
    return bias2, w_t


# ------------------------------------------------------------------------ forward
def pw_layer(x, bias2, w_t, *, tm=None, tn=None, tk=None):
    """Apply PWLayer: (x - bias) @ weight.T

    x:     (..., K)
    bias2: (1, K)     from prepare_pw_params
    w_t:   (K, N)     from prepare_pw_params (pre-transposed weight)
    """
    *lead, K = x.shape
    K2, N = w_t.shape
    assert K2 == K, (K2, K)
    M = 1
    for d in lead:
        M *= d

    x2 = x.reshape(M, K)
    x_is = jnp.dtype(x.dtype).itemsize
    w_is = jnp.dtype(w_t.dtype).itemsize

    budget, vmem_limit = _vmem_caps()
    a_tm, a_tn, a_tk, sub = _choose_tiles(M, K, N, x_is, w_is, budget)
    tm_explicit = tm is not None
    tm = a_tm if tm is None else tm
    tn = a_tn if tn is None else tn
    tk = a_tk if tk is None else tk
    if tk < K:
        assert K % tk == 0, "K tile must divide K exactly"

    grid_m = pl.cdiv(M, tm)
    grid_n = pl.cdiv(N, tn)
    grid_k = pl.cdiv(K, tk)

    # Degenerate-grid guard: give both v7x TensorCores at least one step.
    if (not tm_explicit) and grid_m * grid_n * grid_k == 1 and M >= 2 * sub:
        tm = max(sub, ((tm // 2) + sub - 1) // sub * sub)
        grid_m = pl.cdiv(M, tm)

    # Grid-order choice from an HBM-traffic model (re-reads happen when a block
    # index changes between consecutive grid steps).
    cost_n_outer = (M * K * x_is * grid_n
                    + K * N * w_is * (grid_m if grid_k > 1 else 1))
    cost_m_outer = (M * K * x_is * (grid_n if grid_k > 1 else 1)
                    + K * N * w_is * grid_m)
    m_outer = cost_m_outer < cost_n_outer

    if grid_k == 1:
        kernel = _pw_kernel
        scratch = []
        dimsem = ("parallel", "parallel")
        x_blk, b_blk, w_blk = (tm, K), (1, K), (K, tn)
        if m_outer:
            grid = (grid_m, grid_n)
            x_map = lambda i, j: (i, 0)
            b_map = lambda i, j: (0, 0)
            w_map = lambda i, j: (0, j)
            o_map = lambda i, j: (i, j)
        else:
            grid = (grid_n, grid_m)
            x_map = lambda j, i: (i, 0)
            b_map = lambda j, i: (0, 0)
            w_map = lambda j, i: (0, j)
            o_map = lambda j, i: (i, j)
        x_reads, w_reads = (1, grid_m) if m_outer else (grid_n, 1)
    else:
        kernel = _pw_kernel_acc
        scratch = [pltpu.VMEM((tm, tn), jnp.float32)]
        dimsem = ("parallel", "parallel", "arbitrary")
        x_blk, b_blk, w_blk = (tm, tk), (1, tk), (tk, tn)
        if m_outer:
            grid = (grid_m, grid_n, grid_k)
            x_map = lambda i, j, k: (i, k)
            b_map = lambda i, j, k: (0, k)
            w_map = lambda i, j, k: (k, j)
            o_map = lambda i, j, k: (i, j)
        else:
            grid = (grid_n, grid_m, grid_k)
            x_map = lambda j, i, k: (i, k)
            b_map = lambda j, i, k: (0, k)
            w_map = lambda j, i, k: (k, j)
            o_map = lambda j, i, k: (i, j)
        x_reads, w_reads = grid_n, grid_m

    bytes_accessed = (M * K * x_is * x_reads      # x reads (incl. re-reads)
                      + K * N * w_is * w_reads    # weight reads (incl. re-reads)
                      + M * N * x_is              # output writes (once per tile)
                      + K * w_is)                 # bias

    out = pl.pallas_call(
        kernel,
        out_shape=jax.ShapeDtypeStruct((M, N), x.dtype),
        grid=grid,
        in_specs=[
            pl.BlockSpec(x_blk, x_map),
            pl.BlockSpec(b_blk, b_map),
            pl.BlockSpec(w_blk, w_map),
        ],
        out_specs=pl.BlockSpec((tm, tn), o_map),
        scratch_shapes=scratch,
        compiler_params=pltpu.CompilerParams(
            dimension_semantics=dimsem,
            vmem_limit_bytes=vmem_limit,
        ),
        cost_estimate=pl.CostEstimate(
            flops=2 * M * K * N,
            transcendentals=0,
            bytes_accessed=bytes_accessed,
        ),
    )(x2, bias2, w_t)

    return out.reshape(*lead, N)


if __name__ == "__main__":
    key = jax.random.PRNGKey(0)
    k1, k2, k3, k4, k5, k6 = jax.random.split(key, 6)

    # ---- Small config consistent with the module: PWLayer(32, 64) on (2, 8, 32) ----
    input_size, output_size = 32, 64
    batch, seq = 2, 8
    weight = 0.02 * jax.random.normal(k1, (output_size, input_size), jnp.float32)
    bias = 0.1 * jax.random.normal(k2, (input_size,), jnp.float32)
    x = jax.random.normal(k3, (batch, seq, input_size), jnp.float32)

    bias2, w_t = prepare_pw_params(bias, weight)            # one-time prep
    out = jax.block_until_ready(pw_layer(x, bias2, w_t))
    ref = (x - bias) @ weight.T
    assert out.shape == (batch, seq, output_size)
    assert jnp.allclose(out, ref, atol=1e-4, rtol=1e-4), "small-shape mismatch"

    # ---- Larger config: ragged-M tiling / grid-order path ----
    in2, out2 = 256, 128
    w_big = 0.02 * jax.random.normal(k4, (out2, in2), jnp.float32)
    b_big = 0.1 * jax.random.normal(k5, (in2,), jnp.float32)
    x_big = jax.random.normal(k6, (3, 400, in2), jnp.float32)    # M = 1200
    b2_big, w_t_big = prepare_pw_params(b_big, w_big)
    out_big = jax.block_until_ready(pw_layer(x_big, b2_big, w_t_big))
    ref_big = (x_big - b_big) @ w_big.T
    assert out_big.shape == (3, 400, out2)
    assert jnp.allclose(out_big, ref_big, atol=1e-4, rtol=1e-4), "tiled-shape mismatch"

    # ---- Force the K-reduction (accumulator) path at small shapes ----
    out_acc = jax.block_until_ready(pw_layer(x_big, b2_big, w_t_big, tk=128))
    assert jnp.allclose(out_acc, ref_big, atol=1e-4, rtol=1e-4), "K-tiled mismatch"

    print("KERNEL_OK")
</pallas_src>

<mosaic_0001>
module attributes {stable_mosaic.version = 11 : i64} {
  func.func @_pw_kernel(%arg0: i32, %arg1: i32, %arg2: memref<8x32xf32, #tpu.memory_space<vmem>>, %arg3: memref<1x32xf32, #tpu.memory_space<vmem>>, %arg4: memref<32x64xf32, #tpu.memory_space<vmem>>, %arg5: memref<8x64xf32, #tpu.memory_space<vmem>>) attributes {dimension_semantics = [#tpu.dimension_semantics<parallel>, #tpu.dimension_semantics<parallel>], iteration_bounds = array<i64: 1, 2>, scalar_prefetch = 0 : i64, scratch_operands = 0 : i64, tpu.core_type = #tpu.core_type<tc>, window_params = [{transform_indices = @transform_0, window_bounds = array<i64: 8, 32>}, {pipeline_mode = #tpu.pipeline_mode<synchronous>, transform_indices = @transform_1, window_bounds = array<i64: 1, 32>}, {transform_indices = @transform_2, window_bounds = array<i64: 32, 64>}, {transform_indices = @transform_3, window_bounds = array<i64: 8, 64>}]} {
    %c0 = arith.constant 0 : index
    %c0_0 = arith.constant 0 : index
    %0 = vector.load %arg2[%c0, %c0_0] : memref<8x32xf32, #tpu.memory_space<vmem>>, vector<8x32xf32>
    %c0_1 = arith.constant 0 : index
    %c0_2 = arith.constant 0 : index
    %1 = vector.load %arg3[%c0_1, %c0_2] : memref<1x32xf32, #tpu.memory_space<vmem>>, vector<1x32xf32>
    %2 = vector.broadcast %1 : vector<1x32xf32> to vector<8x32xf32>
    %3 = arith.subf %0, %2 : vector<8x32xf32>
    %c0_3 = arith.constant 0 : index
    %c0_4 = arith.constant 0 : index
    %4 = vector.load %arg4[%c0_3, %c0_4] : memref<32x64xf32, #tpu.memory_space<vmem>>, vector<32x64xf32>
    %cst = arith.constant dense<0.000000e+00> : vector<8x64xf32>
    %5 = tpu.matmul %3, %4, %cst {dimension_numbers = #tpu.dot_dimension_numbers<[1], [0], [0], [1], [0, 0, 1, 1], [], []>} : vector<8x32xf32>, vector<32x64xf32>, vector<8x64xf32> -> vector<8x64xf32>
    %c0_5 = arith.constant 0 : index
    %c0_6 = arith.constant 0 : index
    %6 = vector.load %arg5[%c0_5, %c0_6] : memref<8x64xf32, #tpu.memory_space<vmem>>, vector<8x64xf32>
    tpu.vector_store %arg5[%c0_5, %c0_6], %5 {strides = array<i32>} : memref<8x64xf32, #tpu.memory_space<vmem>>, vector<8x64xf32>,
    return
  }
  func.func @transform_0(%arg0: i32, %arg1: i32) -> (i32, i32) {
    %c0_i32 = arith.constant 0 : i32
    %c0_i32_0 = arith.constant 0 : i32
    return %arg1, %c0_i32 : i32, i32
  }
  func.func @transform_1(%arg0: i32, %arg1: i32) -> (i32, i32) {
    %c0_i32 = arith.constant 0 : i32
    %c0_i32_0 = arith.constant 0 : i32
    %c0_i32_1 = arith.constant 0 : i32
    return %c0_i32, %c0_i32_0 : i32, i32
  }
  func.func @transform_2(%arg0: i32, %arg1: i32) -> (i32, i32) {
    %c0_i32 = arith.constant 0 : i32
    %c0_i32_0 = arith.constant 0 : i32
    return %c0_i32, %arg0 : i32, i32
  }
  func.func @transform_3(%arg0: i32, %arg1: i32) -> (i32, i32) {
    %c0_i32 = arith.constant 0 : i32
    return %arg1, %arg0 : i32, i32
  }
}

</mosaic_0001>

<bundles_post_ra>
// kernel: tpu_custom_call.1
= control target key start
LH: loop header
LB: loop body
LE: loop exit
PB: predicated region body
PF: predicated region fallthrough
CT: control target
= control target key end

     0   :  { %8 = vsyncpa [#allocation3], 0  ;;  %s925_s0 = inlined_call_operand.hbm [shape: f32[16,32], index: 0, kind: input, shape index: {}]   ;;  %s926_s1 = inlined_call_operand.vmem [shape: f32[1,32], index: 1, kind: input, shape index: {}]   ;;  %s927_s2 = inlined_call_operand.hbm [shape: f32[32,64], index: 2, kind: input, shape index: {}]   ;;  %s928_s3 = inlined_call_operand.hbm [shape: f32[16,64], index: 3, kind: output, shape index: {}]  }
   0x1   :  { %10 = vsyncpa [#allocation3 + $0x1], 0 }
   0x2   :  { %11 = vsyncpa [#allocation6], 0 }
   0x3   :  { %12 = vsyncpa [#allocation4], 0 }
   0x4   :  { %14 = vsyncpa [#allocation4 + $0x1], 0  ;;  %s708_s12 = smov 0   ;;  %s710_s13 = smov 0  }
   0x5   :  { %s712_s14 = smov 0   ;;  %s714_s15 = smov 0  }
   0x6   :  { %s716_s16 = smov 0   ;;  %s718_s17 = smov 0  }
   0x7 LB: > { %s417_s18 = sadd.s32 4294967295, %s678_s17   ;;  %s418_s19 = sadd.s32 4294967294, %s678_s17   ;;  %s678_s17 = sphi %s718_s17, %s20_s17   ;;  %s674_s16 = sphi %s716_s16, %s952_s16   ;;  %s670_s15 = sphi %s714_s15, %s951_s15   ;;  %s666_s14 = sphi %s712_s14, %s950_s14   ;;  %s662_s13 = sphi %s710_s13, %s949_s13   ;;  %s658_s12 = sphi %s708_s12, %s948_s12  }
   0x8   : > { %p52_p0 = scmp.ne.s32.totalorder %s662_s13, %s658_s12  ;;  %p742_p1 = scmp.eq.s32.totalorder %s417_s18, 0 }
   0x9   : > { %p746_p2 = scmp.eq.s32.totalorder %s417_s18, 1  ;;  %p131_p3 = scmp.eq.s32.totalorder %s418_s19, 1 }
   0xa   : > { %s933_s20 = scalar_select %p742_p1, 1, 0 }
   0xb   : > { %s934_s21 = scalar_select %p746_p2, 1, 0 }
   0xc   : > { %p752_p4 = por %p742_p1, %p52_p0  ;;  %p419_p5 = scmp.ge.s32.totalorder %s678_s17, 1 }
   0xd   : > { %p757_p6 = por %p131_p3, %p52_p0  ;;  %p138_p7 = scmp.lt.s32.totalorder %s678_s17, 3 }
   0xe   : > { %s935_s22 = scalar_select %p752_p4, 1, 0 }
   0xf   : > { %s936_s23 = scalar_select %p757_p6, 1, 0 }
  0x10   : > { %p762_p8 = pnand %p419_p5, %p138_p7  ;;  %s680_s25 = smov [#allocation5]  }
  0x11   : > { %s155_s26 = sshll.u32 %s680_s25, 4  ;;  %s29_s28 = sadd.s32 1, %s674_s16  ;;  %s156_s26 = int_to_ptr.vmem [resolvable:$true] %s155_s26 }
  0x12   : > { %s937_s24 = scalar_select %p762_p8, 1, 0 }
  0x13   : > { %p464_p9 = pneg %p762_p8  ;;  %s534_s4 = scalar_lea.hbm %s927_s2, 512 }
  0x14   : > { %p535_p12 = scmp.ne.s32.totalorder %s927_s2, %s534_s4  ;;  %p541_p5 = scmp.lt.u32.totalorder %s534_s4, %s927_s2 }
  0x15   : > { %p771_p11 = pnand %p464_p9, %p742_p1 }
  0x17   : > { %p536_p13 = pneg %p771_p11 }
  0x19   : > { %p537_p0 = pnand %p536_p13, %p535_p12 }
  0x1b   : > { %p538_p3 = pneg %p537_p0 }
  0x1d   : > { %p543_p7 = pnand %p541_p5, %p538_p3 }
  0x1f   : > { %546 = shalt.err (!%p543_p7)
}
  0x20   : > { %s547_s9 = scalar_lea.vmem %s156_s26, 512  ;;  %p555_p1 = scmp.lt.s32.totalorder %s156_s26, %s156_s26 }
  0x21   : > { %p548_p9 = scmp.ne.s32.totalorder %s156_s26, %s547_s9  ;;  %p556_p4 = scmp.lt.s32.totalorder %s547_s9, %s547_s9 }
  0x23   : > { %p550_p10 = pnand %p548_p9, %p536_p13  ;;  %p557_p8 = por %p556_p4, %p555_p1 }
  0x25   : > { %p551_p6 = pneg %p550_p10 }
  0x27   : > { %p558_p2 = pnand %p557_p8, %p551_p6 }
  0x29   : > { %561 = shalt.err (!%p558_p2)
}
  0x2a   : > { %s681_s10 = smov 128   ;;  %s682_s11 = smov 8  }
  0x2b   : > { %467 = dma.hbm_to_vmem [thread:$0]  (!%p771_p11), %s927_s2, 512, %s156_s26, [#allocation6], %s681_s10, %s681_s10, %s682_s11  }
  0x2c   : > { %p30_p1 = scmp.ge.s32.totalorder %s29_s28, 2  ;;  %s39_s25 = sadd.s32 1, %s666_s14 }
  0x2d   : > { %p46_p2 = scmp.ne.s32.totalorder %s666_s14, %s662_s13  ;;  %p47_p4 = scmp.eq.s32.totalorder %s678_s17, 0 }
  0x2e   : > { %s954_s28 = smov (%p30_p1, %s29_s28), 0  ;;  %p940_p8 = scmp.ne.s32.totalorder %s934_s21, 0 }
  0x2f   : > { %p798_p6 = por %p47_p4, %p46_p2  ;;  %s36_s27 = ssub.s32 %s674_s16, %s954_s28 }
  0x30   : > { %p804_p10 = por %p940_p8, %p46_p2  ;;  %p477_p12 = scmp.lt.s32.totalorder %s678_s17, 2 }
  0x31   : > { %p37_p11 = scmp.eq.s32.totalorder %s36_s27, 0  ;;  %s169_s26 = sand.u32 1, %s666_s14  }
  0x32   : > { %s422_s4 = sshll.u32 %s169_s26, 3  ;;  %s423_s6 = sshll.u32 %s674_s16, 7 }
  0x33   : > { %s813_s5 = scalar_select %p37_p11, %s666_s14, %s39_s25  }
  0x34   : > { %s819_s9 = scalar_lea.hbm %s925_s0, %s423_s6  ;;  %s173_s21 = scalar_lea.vmem [#allocation2], %s422_s4 }
  0x35   : > { %s180_s10 = sshll.u32 %s173_s21, 4  ;;  %p825_p13 = pnand %p477_p12, %p798_p6  ;;  %s821_s10 = int_to_ptr.vmem [resolvable:$true] %s180_s10 }
  0x36   : > { %s170_s18 = scalar_lea.sflag [#allocation3], %s169_s26  ;;  %s562_s19 = scalar_lea.hbm %s819_s9, 128 }
  0x37   : > { %p563_p0 = scmp.ne.s32.totalorder %s819_s9, %s562_s19  ;;  %p564_p3 = pneg %p825_p13 }
  0x38   : > { %s567_s4 = scalar_lea.hbm %s925_s0, 256  ;;  %p568_p9 = scmp.lt.u32.totalorder %s819_s9, %s925_s0 }
  0x39   : > { %p565_p5 = pnand %p564_p3, %p563_p0  ;;  %p569_p1 = scmp.lt.u32.totalorder %s567_s4, %s562_s19 }
  0x3a   : > { %p571_p4 = scmp.lt.u32.totalorder %s562_s19, %s819_s9 }
  0x3b   : > { %p566_p7 = pneg %p565_p5  ;;  %p570_p2 = por %p569_p1, %p568_p9 }
  0x3d   : > { %p572_p6 = por %p571_p4, %p570_p2 }
  0x3f   : > { %p573_p8 = pnand %p572_p6, %p566_p7 }
  0x41   : > { %576 = shalt.err (!%p573_p8)
}
  0x42   : > { %s577_s26 = scalar_lea.vmem %s821_s10, 128  ;;  %s683_s7 = smov [#allocation2]  }
  0x43   : > { %p578_p12 = scmp.ne.s32.totalorder %s821_s10, %s577_s26  ;;  %s582_s8 = sshll.u32 %s683_s7, 4  ;;  %s583_s8 = int_to_ptr.vmem [resolvable:$false] %s582_s8 }
  0x44   : > { %s584_s21 = scalar_lea.vmem %s583_s8, 256  ;;  %p585_p5 = scmp.lt.s32.totalorder %s821_s10, %s583_s8 }
  0x45   : > { %p580_p11 = pnand %p578_p12, %p564_p3  ;;  %p586_p9 = scmp.lt.s32.totalorder %s584_s21, %s577_s26 }
  0x47   : > { %p581_p0 = pneg %p580_p11  ;;  %p587_p1 = por %p586_p9, %p585_p5 }
  0x49   : > { %p588_p2 = pnand %p587_p1, %p581_p0 }
  0x4b   : > { %591 = shalt.err (!%p588_p2)
}
  0x4c   : > { %471 = dma.hbm_to_vmem [thread:$0]  (!%p825_p13), %s819_s9, 128, %s821_s10, %s170_s18  }
  0x4d   : > { %p943_p7 = scmp.ne.s32.totalorder %s937_s24, 0 }
  0x4e   : > { %s857_s19 = sand.u32 (!%p943_p7), 1, %s662_s13   ;;  %p944_p3 = scmp.ne.s32.totalorder (!%p943_p7), %s935_s22, 0 }
  0x4f   : > { %189 = sbr.rel (%p943_p7) target bundleno = 327 (0x147), region = 32  ;;  %s425_s25 = sshll.u32 (!%p943_p7), %s857_s19, 3 }
  0x50   : > { %s192_s27 = scalar_lea.sflag (!%p943_p7), [#allocation3], %s857_s19  ;;  %s195_s4 = scalar_lea.vmem (!%p943_p7), [#allocation2], %s425_s25 }
  0x56   : > { %645 = dma.done.wait (%p944_p3), %s192_s27, 128  }
  0x57   : > { %647 = vsyncadd (%p944_p3), %s192_s27, 4294967168  ;;  %p945_p4 = scmp.ne.s32.totalorder %s933_s20, 0 }
  0x59   : > { %649 = dma.done.wait (%p945_p4), [#allocation6], 512  }
  0x5a   : > { %651 = vsyncadd (%p945_p4), [#allocation6], 4294966784  ;;  %v684_v0 = vmov 0.0|0.0   ;;  %vm685_vm0 = vmmov 0   ;;  %v686_v1 = vmov 0.0   ;;  %v231_v2 = vld [vmem:[#allocation5] sm:$0xff] }
  0x5b   : > { %450 = vmatprep.subr.bf16.mxu0 %v684_v0  ;;  %447 = vmatprep.mubr.msk.f32.mxu0 %vm685_vm0, %v686_v1  ;;  %v232_v3 = vld [vmem:[#allocation5 + $0x8] sm:$0xff]  ;;  %v233_v4 = vld [vmem:[#allocation5 + $0x10] sm:$0xff]  ;;  %v234_v6 = vld [vmem:[#allocation5 + $0x18] sm:$0xff]  ;;  %vm235_vm1 = vcmask 261120   ;;  %s431_s20 = sshll.u32 %s670_s15, 7  ;;  %s221_s9 = scalar_lea.vmem [#allocation7], %s425_s25 }
  0x5c   : > { %v451_v5 = vpack.c.bf16 %v232_v3, %v231_v2  ;;  %v454_v7 = vpack.c.bf16 %v234_v6, %v233_v4  ;;  %v222_v8 = vld [vmem:[%s195_s4] sm:$0xff]  ;;  %s326_s10 = sshll.u32 %s221_s9, 4  ;;  %vm309_vm2 = vcmask 523264   ;;  %s876_s29 = scalar_lea.hbm %s928_s3, %s431_s20  ;;  %s878_s10 = int_to_ptr.vmem [resolvable:$true] %s326_s10 }
  0x5d   : > { %v428_v9 = vld [vmem:[%s926_s1] ss:$0 sm:$0xff]  ;;  %s312_s6 = scalar_lea.sflag [#allocation4], %s857_s19  ;;  %s592_s26 = scalar_lea.vmem %s878_s10, 128 }
  0x5e   : > { %452 = vmatpush3.bf16.msra.mxu0 %v451_v5  ;;  %v230_v10 = vsub.f32 %v222_v8, %v428_v9  ;;  %p593_p13 = scmp.ne.s32.totalorder %s878_s10, %s592_s26  ;;  %s687_s15 = smov [#allocation7]  }
  0x5f   : > { %453 = vmatprep.subr.bf16.mxu0 %v684_v0  ;;  %s596_s7 = sshll.u32 %s687_s15, 4  ;;  %s597_s7 = int_to_ptr.vmem [resolvable:$false] %s596_s7 }
  0x60   : > { %p594_p6 = pnand %p593_p13, %p804_p10  ;;  %s598_s8 = scalar_lea.vmem %s597_s7, 256 }
  0x61   : > { %p599_p12 = scmp.lt.s32.totalorder %s878_s10, %s597_s7  ;;  %p600_p11 = scmp.lt.s32.totalorder %s598_s8, %s592_s26 }
  0x62   : > { %455 = vmatpush3.bf16.msra.mxu0 %v454_v7  ;;  %p595_p8 = pneg %p594_p6 }
  0x63   : > { %p601_p0 = por %p600_p11, %p599_p12 }
  0x65   : > { %448 = vmatmul.mubr.msk.f32.vlgmr.msra.gmra.mrb[0].mxu0 %vm235_vm1, %v230_v10  ;;  %p602_p5 = pnand %p601_p0, %p595_p8 }
 0x138   : > { %v305_v11 = vpop.f32.mrb[0].mxu0 }
 0x139   : > { %310 = vst.msk [vmem:[%s221_s9] sm:$0xff] %vm309_vm2, %v305_v11  ;;  %v449_v12 = vpop.f32.mrb[1].mxu0 }
 0x13a   : > { %605 = shalt.err (!%p602_p5)
}
 0x13b   : > { %s606_s21 = scalar_lea.hbm %s876_s29, 128  ;;  %s610_s27 = scalar_lea.hbm %s928_s3, 256 }
 0x13c   : > { %p607_p9 = scmp.ne.s32.totalorder %s876_s29, %s606_s21  ;;  %p611_p7 = scmp.lt.u32.totalorder %s876_s29, %s928_s3 }
 0x13d   : > { %p612_p3 = scmp.lt.u32.totalorder %s610_s27, %s606_s21  ;;  %p614_p13 = scmp.lt.u32.totalorder %s606_s21, %s876_s29 }
 0x13e   : > { %p608_p1 = pnand %p607_p9, %p804_p10 }
 0x13f   : > { %p613_p4 = por %p612_p3, %p611_p7 }
 0x140   : > { %p609_p2 = pneg %p608_p1 }
 0x141   : > { %p615_p6 = por %p614_p13, %p613_p4 }
 0x143   : > { %p616_p8 = pnand %p615_p6, %p609_p2 }
 0x145   : > { %619 = shalt.err (!%p616_p8)
}
 0x146   : > { %462 = dma.vmem_to_hbm [thread:$0]  (%p804_p10), %s878_s10, 128, %s876_s29, %s312_s6  }
 0x147 PF: > { %s338_s24 = sand.u32 1, %s658_s12   ;;  %p946_p12 = scmp.ne.s32.totalorder %s936_s23, 0 }
 0x148   : > { %p947_p11 = scmp.ge.s32.totalorder %s678_s17, 2  ;;  %s339_s20 = scalar_lea.sflag [#allocation4], %s338_s24 }
 0x14a   : > { %p473_p0 = pnand %p947_p11, %p946_p12 }
 0x14c   : > { %653 = dma.done.wait (!%p473_p0), %s339_s20, 128  }
 0x14d   : > { %655 = vsyncadd (!%p473_p0), %s339_s20, 4294967168  ;;  %s20_s17 = sadd.s32 1, %s678_s17   ;;  %s948_s12 = smov %s662_s13 }
 0x14e   : > { %p17_p5 = scmp.ge.s32.totalorder %s20_s17, 4   ;;  %s949_s13 = smov %s666_s14 }
 0x14f   : > { %s950_s14 = smov %s813_s5  ;;  %s951_s15 = smov %s674_s16 }
 0x150   : > { %s952_s16 = smov %s954_s28  ;;  %19 = sbr.rel (!%p17_p5) target bundleno = 7 (0x7), region = 82 }
 0x157   :  { %344 = vsyncpa [#allocation3], 1 }
 0x158   :  { %346 = vsyncpa [#allocation3 + $0x1], 1 }
 0x159   :  { %347 = vsyncpa [#allocation6], 1 }
 0x15a   :  { %348 = vsyncpa [#allocation4], 1 }
 0x15b   :  { %350 = vsyncpa [#allocation4 + $0x1], 1 }

</bundles_post_ra>
